<compile_context>
chip_gen: v6e
topology: v6e:2x2x1
jax: 0.10.0
libtpu: 0.0.40
codegen_flags: <defaults>
</compile_context>

<pallas_src>
import functools

import jax
import jax.numpy as jnp
from jax.experimental import pallas as pl
from jax.experimental.pallas import tpu as pltpu


TILE_N_MAX = 4096   # batch lanes per grid step (one value for all TPU gens)
CHUNK_MAX = 512     # lanes per inner-loop sub-chunk


def _tpu_generation() -> int:
    """Best-effort TPU generation (7/6/5/...); 0 if unknown."""
    try:
        kind = jax.devices()[0].device_kind.lower()
    except Exception:
        return 0
    for g in (7, 6, 5, 4):
        if f"v{g}" in kind:
            return g
    return 0


def _make_kernel(n_chunks: int, chunk: int, use_bf16_act: bool):
    act_dtype = jnp.bfloat16 if use_bf16_act else jnp.float32

    def kernel(x_ref, w1_ref, b1_ref, w2_ref, b2_ref,
               w3_ref, b3_ref, w4_ref, b4_ref, o_ref):
        # Weights / biases are VMEM-resident (constant index_map); w2/w3 are
        # already bf16 (pre-cast in the wrapper), everything else is f32.
        w1 = w1_ref[...]          # [hid, 2]
        b1 = b1_ref[...]          # [hid, 1]
        w2 = w2_ref[...]          # [hid, hid] bf16
        b2 = b2_ref[...]          # [hid, 1]
        w3 = w3_ref[...]          # [hid, hid] bf16
        b3 = b3_ref[...]          # [hid, 1]
        w4 = w4_ref[...]          # [hid, 1]
        b4 = b4_ref[...]          # [1, 1]

        def body(j, carry):
            start = pl.multiple_of(j * chunk, chunk)
            x = x_ref[:, pl.ds(start, chunk)]              # [2, chunk] f32

            # fc1 (K=2): two VPU broadcast FMAs + tanh.
            h = w1[:, 0:1] * x[0:1, :] + w1[:, 1:2] * x[1:2, :] + b1
            h = jnp.tanh(h.astype(act_dtype))              # [hid, chunk]

            # fc2 / fc3: [hid,hid] @ [hid,chunk] on the MXU, bf16 operands,
            # f32 accumulation; bias-add in f32, tanh in act_dtype.
            h = jnp.dot(w2, h.astype(jnp.bfloat16),
                        preferred_element_type=jnp.float32) + b2
            h = jnp.tanh(h.astype(act_dtype))
            h = jnp.dot(w3, h.astype(jnp.bfloat16),
                        preferred_element_type=jnp.float32) + b3
            h = jnp.tanh(h.astype(act_dtype))

            # fc4 (out_features=1): multiply + sublane reduction (VPU/XLU).
            z = jnp.sum(w4 * h, axis=0, keepdims=True) + b4   # [1, chunk] f32

            # sigmoid(z) == 0.5 * tanh(0.5 * z) + 0.5  -> single EUP op.
            o_ref[:, pl.ds(start, chunk)] = (
                0.5 * jnp.tanh(0.5 * z) + 0.5).astype(o_ref.dtype)
            return carry

        jax.lax.fori_loop(0, n_chunks, body, 0, unroll=True)

    return kernel


def _pick_tiling(n: int, two_core_clamp: bool):
    """Choose (tile_n, chunk, n_pad) for a batch of n rows."""
    n_pad128 = pl.cdiv(n, 128) * 128
    tile_n = min(TILE_N_MAX, n_pad128)
    if two_core_clamp and n_pad128 >= 256:
        # Keep >=2 grid steps so both v7x TensorCores get work.
        tile_n = min(tile_n, max(128, (n_pad128 // 2) // 128 * 128))
    # Inner sub-chunk width: largest of {512, 256, 128} dividing tile_n.
    chunk = 128
    for c in (CHUNK_MAX, 256, 128):
        if tile_n % c == 0:
            chunk = c
            break
    n_pad = pl.cdiv(n, tile_n) * tile_n
    return tile_n, chunk, n_pad


@functools.partial(jax.jit,
                   static_argnames=("tile_n", "chunk", "n_pad", "use_bf16_act"))
def _forward_impl(x, w1, b1, w2, b2, w3, b3, w4, b4,
                  *, tile_n, chunk, n_pad, use_bf16_act):
    n = x.shape[0]
    # Fused transpose + pad (single XLA copy); producers that already hold x
    # as a padded [2, n_pad] slab can feed the pallas_call directly instead.
    xt = jnp.zeros((2, n_pad), x.dtype).at[:, :n].set(x.T)

    # Pre-cast matmul weights to bf16 once, outside the kernel / grid loop.
    w2b = w2.astype(jnp.bfloat16)
    w3b = w3.astype(jnp.bfloat16)

    resident = lambda a: pl.BlockSpec(a.shape, lambda i: (0, 0))
    n_chunks = tile_n // chunk

    out_t = pl.pallas_call(
        _make_kernel(n_chunks, chunk, use_bf16_act),
        out_shape=jax.ShapeDtypeStruct((1, n_pad), jnp.float32),
        grid=(n_pad // tile_n,),
        in_specs=[
            pl.BlockSpec((2, tile_n), lambda i: (0, i)),   # x tile (advances)
            resident(w1), resident(b1),
            resident(w2b), resident(b2),
            resident(w3b), resident(b3),
            resident(w4), resident(b4),
        ],
        out_specs=pl.BlockSpec((1, tile_n), lambda i: (0, i)),
        compiler_params=pltpu.CompilerParams(
            dimension_semantics=("parallel",)),            # megacore on v7x
    )(xt, w1, b1, w2b, b2, w3b, b3, w4, b4)

    return out_t[:, :n].T                                  # [N, 1]


def full3net_forward(x, params):
    """x: [N, 2] float32.  Returns [N, 1] float32 (matches the PyTorch module)."""
    gen = _tpu_generation()
    use_bf16_act = gen >= 6          # bf16 EUP/VPU exist on v6e/v7x only
    two_core_clamp = gen >= 7        # keep >=2 grid steps on 2-TC chips
    tile_n, chunk, n_pad = _pick_tiling(x.shape[0], two_core_clamp)
    w1, b1 = params["fc1"]
    w2, b2 = params["fc2"]
    w3, b3 = params["fc3"]
    w4, b4 = params["fc4"]
    return _forward_impl(x, w1, b1, w2, b2, w3, b3, w4, b4,
                         tile_n=tile_n, chunk=chunk, n_pad=n_pad,
                         use_bf16_act=use_bf16_act)


def init_params(key, hid):
    """nn.Linear-style init.

    fc1..fc3 weights are PyTorch-native [out, in]; fc4 is a [hid, 1] column
    and biases are [out, 1] columns for cheap lane broadcasts in-kernel.
    """
    shapes = {
        "fc1": ((hid, 2), (hid, 1), 2),
        "fc2": ((hid, hid), (hid, 1), hid),
        "fc3": ((hid, hid), (hid, 1), hid),
        "fc4": ((hid, 1), (1, 1), hid),
    }
    params = {}
    for name, (w_shape, b_shape, fan_in) in shapes.items():
        key, kw, kb = jax.random.split(key, 3)
        bound = 1.0 / jnp.sqrt(fan_in)
        params[name] = (
            jax.random.uniform(kw, w_shape, jnp.float32, -bound, bound),
            jax.random.uniform(kb, b_shape, jnp.float32, -bound, bound),
        )
    return params


def reference_forward(x, params):
    w1, b1 = params["fc1"]
    w2, b2 = params["fc2"]
    w3, b3 = params["fc3"]
    w4, b4 = params["fc4"]
    h = jnp.tanh(x @ w1.T + b1.T)
    h = jnp.tanh(h @ w2.T + b2.T)
    h = jnp.tanh(h @ w3.T + b3.T)
    return jax.nn.sigmoid(h @ w4 + b4.T)


if __name__ == "__main__":
    hid = 32
    key = jax.random.PRNGKey(0)
    key, kp = jax.random.split(key)
    params = init_params(kp, hid)

    # Small batch (single tile) + a multi-chunk ragged batch that exercises
    # the inner chunk loop, grid index_maps and tail padding/masking.
    for batch in (8, 1280):
        key, kx = jax.random.split(key)
        x = jax.random.normal(kx, (batch, 2), jnp.float32)
        out = jax.block_until_ready(full3net_forward(x, params))
        ref = reference_forward(x, params)
        assert out.shape == (batch, 1)
        assert jnp.allclose(out, ref, atol=2e-2, rtol=0.0), float(
            jnp.max(jnp.abs(out - ref)))
    print("KERNEL_OK")
</pallas_src>

<mosaic_0001>
module attributes {stable_mosaic.version = 11 : i64} {
  func.func @kernel(%arg0: i32, %arg1: memref<2x128xf32, #tpu.memory_space<vmem>>, %arg2: memref<32x2xf32, #tpu.memory_space<vmem>>, %arg3: memref<32x1xf32, #tpu.memory_space<vmem>>, %arg4: memref<32x32xbf16, #tpu.memory_space<vmem>>, %arg5: memref<32x1xf32, #tpu.memory_space<vmem>>, %arg6: memref<32x32xbf16, #tpu.memory_space<vmem>>, %arg7: memref<32x1xf32, #tpu.memory_space<vmem>>, %arg8: memref<32x1xf32, #tpu.memory_space<vmem>>, %arg9: memref<1x1xf32, #tpu.memory_space<vmem>>, %arg10: memref<1x128xf32, #tpu.memory_space<vmem>>) attributes {dimension_semantics = [#tpu.dimension_semantics<parallel>], iteration_bounds = array<i64: 1>, scalar_prefetch = 0 : i64, scratch_operands = 0 : i64, tpu.core_type = #tpu.core_type<tc>, window_params = [{transform_indices = @transform_0, window_bounds = array<i64: 2, 128>}, {pipeline_mode = #tpu.pipeline_mode<synchronous>, transform_indices = @transform_1, window_bounds = array<i64: 32, 2>}, {pipeline_mode = #tpu.pipeline_mode<synchronous>, transform_indices = @transform_2, window_bounds = array<i64: 32, 1>}, {pipeline_mode = #tpu.pipeline_mode<synchronous>, transform_indices = @transform_3, window_bounds = array<i64: 32, 32>}, {pipeline_mode = #tpu.pipeline_mode<synchronous>, transform_indices = @transform_4, window_bounds = array<i64: 32, 1>}, {pipeline_mode = #tpu.pipeline_mode<synchronous>, transform_indices = @transform_5, window_bounds = array<i64: 32, 32>}, {pipeline_mode = #tpu.pipeline_mode<synchronous>, transform_indices = @transform_6, window_bounds = array<i64: 32, 1>}, {pipeline_mode = #tpu.pipeline_mode<synchronous>, transform_indices = @transform_7, window_bounds = array<i64: 32, 1>}, {pipeline_mode = #tpu.pipeline_mode<synchronous>, transform_indices = @transform_8, window_bounds = array<i64: 1, 1>}, {transform_indices = @transform_9, window_bounds = array<i64: 1, 128>}]} {
    %c0 = arith.constant 0 : index
    %c0_0 = arith.constant 0 : index
    %0 = vector.load %arg2[%c0, %c0_0] : memref<32x2xf32, #tpu.memory_space<vmem>>, vector<32x2xf32>
    %c0_1 = arith.constant 0 : index
    %c0_2 = arith.constant 0 : index
    %1 = vector.load %arg3[%c0_1, %c0_2] : memref<32x1xf32, #tpu.memory_space<vmem>>, vector<32x1xf32>
    %c0_3 = arith.constant 0 : index
    %c0_4 = arith.constant 0 : index
    %2 = vector.load %arg4[%c0_3, %c0_4] : memref<32x32xbf16, #tpu.memory_space<vmem>>, vector<32x32xbf16>
    %c0_5 = arith.constant 0 : index
    %c0_6 = arith.constant 0 : index
    %3 = vector.load %arg5[%c0_5, %c0_6] : memref<32x1xf32, #tpu.memory_space<vmem>>, vector<32x1xf32>
    %c0_7 = arith.constant 0 : index
    %c0_8 = arith.constant 0 : index
    %4 = vector.load %arg6[%c0_7, %c0_8] : memref<32x32xbf16, #tpu.memory_space<vmem>>, vector<32x32xbf16>
    %c0_9 = arith.constant 0 : index
    %c0_10 = arith.constant 0 : index
    %5 = vector.load %arg7[%c0_9, %c0_10] : memref<32x1xf32, #tpu.memory_space<vmem>>, vector<32x1xf32>
    %c0_11 = arith.constant 0 : index
    %c0_12 = arith.constant 0 : index
    %6 = vector.load %arg8[%c0_11, %c0_12] : memref<32x1xf32, #tpu.memory_space<vmem>>, vector<32x1xf32>
    %c0_13 = arith.constant 0 : index
    %c0_14 = arith.constant 0 : index
    %7 = vector.load %arg9[%c0_13, %c0_14] : memref<1x1xf32, #tpu.memory_space<vmem>>, vector<1x1xf32>
    %c0_i32 = arith.constant 0 : i32
    %c128_i32 = arith.constant 128 : i32
    %8 = arith.muli %c0_i32, %c128_i32 : i32
    %9 = tpu.assume_multiple %8, 128 : i32
    %c0_15 = arith.constant 0 : index
    %10 = arith.index_cast %9 : i32 to index
    %11 = vector.load %arg1[%c0_15, %10] : memref<2x128xf32, #tpu.memory_space<vmem>>, vector<2x128xf32>
    %12 = vector.extract_strided_slice %0 {offsets = [0, 0], sizes = [32, 1], strides = [1, 1]} : vector<32x2xf32> to vector<32x1xf32>
    %13 = vector.extract_strided_slice %11 {offsets = [0, 0], sizes = [1, 128], strides = [1, 1]} : vector<2x128xf32> to vector<1x128xf32>
    %14 = vector.broadcast %12 : vector<32x1xf32> to vector<32x128xf32>
    %15 = vector.broadcast %13 : vector<1x128xf32> to vector<32x128xf32>
    %16 = arith.mulf %14, %15 : vector<32x128xf32>
    %17 = vector.extract_strided_slice %0 {offsets = [0, 1], sizes = [32, 1], strides = [1, 1]} : vector<32x2xf32> to vector<32x1xf32>
    %18 = vector.extract_strided_slice %11 {offsets = [1, 0], sizes = [1, 128], strides = [1, 1]} : vector<2x128xf32> to vector<1x128xf32>
    %19 = vector.broadcast %17 : vector<32x1xf32> to vector<32x128xf32>
    %20 = vector.broadcast %18 : vector<1x128xf32> to vector<32x128xf32>
    %21 = arith.mulf %19, %20 : vector<32x128xf32>
    %22 = arith.addf %16, %21 : vector<32x128xf32>
    %23 = vector.broadcast %1 : vector<32x1xf32> to vector<32x128xf32>
    %24 = arith.addf %22, %23 : vector<32x128xf32>
    %25 = math.tanh %24 : vector<32x128xf32>
    %26 = arith.truncf %25 : vector<32x128xf32> to vector<32x128xbf16>
    %cst = arith.constant dense<0.000000e+00> : vector<32x128xf32>
    %27 = tpu.matmul %2, %26, %cst {dimension_numbers = #tpu.dot_dimension_numbers<[1], [0], [0], [1], [0, 0, 1, 1], [], []>} : vector<32x32xbf16>, vector<32x128xbf16>, vector<32x128xf32> -> vector<32x128xf32>
    %28 = vector.broadcast %3 : vector<32x1xf32> to vector<32x128xf32>
    %29 = arith.addf %27, %28 : vector<32x128xf32>
    %30 = math.tanh %29 : vector<32x128xf32>
    %31 = arith.truncf %30 : vector<32x128xf32> to vector<32x128xbf16>
    %cst_16 = arith.constant dense<0.000000e+00> : vector<32x128xf32>
    %32 = tpu.matmul %4, %31, %cst_16 {dimension_numbers = #tpu.dot_dimension_numbers<[1], [0], [0], [1], [0, 0, 1, 1], [], []>} : vector<32x32xbf16>, vector<32x128xbf16>, vector<32x128xf32> -> vector<32x128xf32>
    %33 = vector.broadcast %5 : vector<32x1xf32> to vector<32x128xf32>
    %34 = arith.addf %32, %33 : vector<32x128xf32>
    %35 = math.tanh %34 : vector<32x128xf32>
    %36 = vector.broadcast %6 : vector<32x1xf32> to vector<32x128xf32>
    %37 = arith.mulf %36, %35 : vector<32x128xf32>
    %cst_17 = arith.constant dense<0.000000e+00> : vector<128xf32>
    %38 = vector.multi_reduction <add>, %37, %cst_17 [0] : vector<32x128xf32> to vector<128xf32>
    %39 = vector.shape_cast %38 : vector<128xf32> to vector<1x128xf32>
    %40 = vector.broadcast %7 : vector<1x1xf32> to vector<1x128xf32>
    %41 = arith.addf %39, %40 : vector<1x128xf32>
    %cst_18 = arith.constant 5.000000e-01 : f32
    %42 = vector.broadcast %cst_18 : f32 to vector<1x128xf32>
    %43 = arith.mulf %42, %41 : vector<1x128xf32>
    %44 = math.tanh %43 : vector<1x128xf32>
    %cst_19 = arith.constant 5.000000e-01 : f32
    %45 = vector.broadcast %cst_19 : f32 to vector<1x128xf32>
    %46 = arith.mulf %45, %44 : vector<1x128xf32>
    %cst_20 = arith.constant 5.000000e-01 : f32
    %47 = vector.broadcast %cst_20 : f32 to vector<1x128xf32>
    %48 = arith.addf %46, %47 : vector<1x128xf32>
    %c0_21 = arith.constant 0 : index
    %49 = arith.index_cast %9 : i32 to index
    %50 = vector.load %arg10[%c0_21, %49] : memref<1x128xf32, #tpu.memory_space<vmem>>, vector<1x128xf32>
    tpu.vector_store %arg10[%c0_21, %49], %48 {strides = array<i32>} : memref<1x128xf32, #tpu.memory_space<vmem>>, vector<1x128xf32>,
    %c1_i32 = arith.constant 1 : i32
    return
  }
  func.func @transform_0(%arg0: i32) -> (i32, i32) {
    %c0_i32 = arith.constant 0 : i32
    %c0_i32_0 = arith.constant 0 : i32
    return %c0_i32, %arg0 : i32, i32
  }
  func.func @transform_1(%arg0: i32) -> (i32, i32) {
    %c0_i32 = arith.constant 0 : i32
    %c0_i32_0 = arith.constant 0 : i32
    %c0_i32_1 = arith.constant 0 : i32
    return %c0_i32, %c0_i32_0 : i32, i32
  }
  func.func @transform_2(%arg0: i32) -> (i32, i32) {
    %c0_i32 = arith.constant 0 : i32
    %c0_i32_0 = arith.constant 0 : i32
    %c0_i32_1 = arith.constant 0 : i32
    return %c0_i32, %c0_i32_0 : i32, i32
  }
  func.func @transform_3(%arg0: i32) -> (i32, i32) {
    %c0_i32 = arith.constant 0 : i32
    %c0_i32_0 = arith.constant 0 : i32
    %c0_i32_1 = arith.constant 0 : i32
    return %c0_i32, %c0_i32_0 : i32, i32
  }
  func.func @transform_4(%arg0: i32) -> (i32, i32) {
    %c0_i32 = arith.constant 0 : i32
    %c0_i32_0 = arith.constant 0 : i32
    %c0_i32_1 = arith.constant 0 : i32
    return %c0_i32, %c0_i32_0 : i32, i32
  }
  func.func @transform_5(%arg0: i32) -> (i32, i32) {
    %c0_i32 = arith.constant 0 : i32
    %c0_i32_0 = arith.constant 0 : i32
    %c0_i32_1 = arith.constant 0 : i32
    return %c0_i32, %c0_i32_0 : i32, i32
  }
  func.func @transform_6(%arg0: i32) -> (i32, i32) {
    %c0_i32 = arith.constant 0 : i32
    %c0_i32_0 = arith.constant 0 : i32
    %c0_i32_1 = arith.constant 0 : i32
    return %c0_i32, %c0_i32_0 : i32, i32
  }
  func.func @transform_7(%arg0: i32) -> (i32, i32) {
    %c0_i32 = arith.constant 0 : i32
    %c0_i32_0 = arith.constant 0 : i32
    %c0_i32_1 = arith.constant 0 : i32
    return %c0_i32, %c0_i32_0 : i32, i32
  }
  func.func @transform_8(%arg0: i32) -> (i32, i32) {
    %c0_i32 = arith.constant 0 : i32
    %c0_i32_0 = arith.constant 0 : i32
    %c0_i32_1 = arith.constant 0 : i32
    return %c0_i32, %c0_i32_0 : i32, i32
  }
  func.func @transform_9(%arg0: i32) -> (i32, i32) {
    %c0_i32 = arith.constant 0 : i32
    %c0_i32_0 = arith.constant 0 : i32
    return %c0_i32, %arg0 : i32, i32
  }
}

</mosaic_0001>

<bundles_post_ra>
// kernel: _forward_impl.1
= control target key start
LH: loop header
LB: loop body
LE: loop exit
PB: predicated region body
PF: predicated region fallthrough
CT: control target
= control target key end

     0   :  { %v454_v0 = vmov 1   ;;  %v455_v5 = vmov 0   ;;  %vm181_vm0 = vcmask 261120   ;;  %v85_v25 = vlaneseq  ;;  %s599_s1 = inlined_call_operand.vmem [shape: f32[32,2], index: 1, kind: input, shape index: {}]   ;;  %s600_s8 = inlined_call_operand.<no memory space> [shape: f32[1,1], index: 8, kind: input, shape index: {}]   ;;  %s601_s2 = inlined_call_operand.vmem [shape: f32[32,1], index: 2, kind: input, shape index: {}]   ;;  %s602_s4 = inlined_call_operand.vmem [shape: f32[32,1], index: 4, kind: input, shape index: {}]   ;;  %s603_s6 = inlined_call_operand.vmem [shape: f32[32,1], index: 6, kind: input, shape index: {}]   ;;  %s604_s7 = inlined_call_operand.vmem [shape: f32[32,1], index: 7, kind: input, shape index: {}]   ;;  %s605_s3 = inlined_call_operand.vmem [shape: bf16[32,32], index: 3, kind: input, shape index: {}]   ;;  %s606_s0 = inlined_call_operand.vmem [shape: f32[2,128], index: 0, kind: input, shape index: {}]   ;;  %s607_s5 = inlined_call_operand.vmem [shape: bf16[32,32], index: 5, kind: input, shape index: {}]   ;;  %s608_s9 = inlined_call_operand.vmem [shape: f32[1,128], index: 9, kind: output, shape index: {}]  }
   0x1   :  { %420 = vset.pattern.permute.xlu0 %v454_v0  ;;  %418 = vset.pattern.permute.xlu1 %v454_v0  ;;  %v37_v1 = vld [vmem:[%s599_s1 + $0x10] sm:$0xff]  ;;  %v35_v2 = vld [vmem:[%s599_s1] sm:$0xff]  ;;  %v14_v3 = vstv %s600_s8  ;;  %v38_v4 = vld [vmem:[%s599_s1 + $0x18] sm:$0xff] }
   0x2   :  { %102 = vperm.xlu1 %418, %v37_v1   ;;  %94 = vperm.xlu0 %420, %v35_v2   ;;  %15 = vst [vmem:[#allocation2] sm:$0x1] %v14_v3  ;;  %v36_v6 = vld [vmem:[%s599_s1 + $0x8] sm:$0xff]  ;;  %v42_v7 = vld [vmem:[%s601_s2 + $0x18] sm:$0xff]  ;;  %v41_v8 = vld [vmem:[%s601_s2 + $0x10] sm:$0xff]  ;;  %v573_v28 = vshrl.u32 %v85_v25, 7 }
   0x3   :  { %v49_v9 = vld [vmem:[%s602_s4 + $0x10] sm:$0xff]  ;;  %v39_v10 = vld [vmem:[%s601_s2] sm:$0xff]  ;;  %v40_v12 = vld [vmem:[%s601_s2 + $0x8] sm:$0xff] }
   0x4   :  { %v47_v11 = vld [vmem:[%s602_s4] sm:$0xff]  ;;  %v50_v14 = vld [vmem:[%s602_s4 + $0x18] sm:$0xff]  ;;  %v57_v15 = vld [vmem:[%s603_s6 + $0x10] sm:$0xff]  ;;  %v87_v31 = vsub.s32 0, %v573_v28  ;;  %v111_v32 = vsub.s32 1, %v573_v28 }
   0x5   :  { %v55_v13 = vld [vmem:[%s603_s6] sm:$0xff]  ;;  %v48_v16 = vld [vmem:[%s602_s4 + $0x8] sm:$0xff]  ;;  %v61_v19 = vld [vmem:[%s604_s7 + $0x10] sm:$0xff] }
   0x6   :  { %106 = vperm.xlu1 %418, %v38_v4   ;;  %421 = vset.pattern.permute.xlu0 %v455_v5  ;;  %v59_v17 = vld [vmem:[%s604_s7] sm:$0xff]  ;;  %v56_v18 = vld [vmem:[%s603_s6 + $0x8] sm:$0xff]  ;;  %v58_v20 = vld [vmem:[%s603_s6 + $0x18] sm:$0xff] }
   0x7   :  { %77 = vperm.xlu0 %421, %v37_v1   ;;  %v424_v22 = vld [vmem:[%s605_s3] sm:$0xff]   ;;  %v60_v23 = vld [vmem:[%s604_s7 + $0x8] sm:$0xff]  ;;  %v62_v24 = vld [vmem:[%s604_s7 + $0x18] sm:$0xff] }
   0x8   :  { %404 = vmatprep.mubr.msk.bf16.mxu0 %vm181_vm0, %v424_v22  ;;  %v64_v33 = vld [vmem:[%s606_s0] sm:$0x3]  ;;  %v427_v22 = vld [vmem:[%s607_s5 + $0x8] sm:$0xff]  }
   0x9   :  { %v63_v21 = vld [vmem:[#allocation2] sm:$0x1]  ;;  %v88_v36 = vrot.slane %v64_v33, %v87_v31  ;;  %v112_v37 = vrot.slane %v64_v33, %v111_v32 }
   0xa   :  { %419 = vset.pattern.permute.xlu1 %v455_v5  ;;  %v426_v3 = vld [vmem:[%s607_s5] sm:$0xff]  }
   0xb   :  { %72 = vperm.xlu1 %419, %v36_v6   ;;  %82 = vperm.xlu0 %421, %v38_v4  }
   0xc   :  { %412 = vmatprep.mubr.msk.bf16.mxu1 %vm181_vm0, %v426_v3 }
   0xf   :  { %422 = vset.pattern.permute.xlu1 %v454_v0  ;;  %67 = vperm.xlu0 %421, %v35_v2   ;;  %v425_v2 = vld [vmem:[%s605_s3 + $0x8] sm:$0xff]  }
  0x10   :  { %98 = vperm.xlu1 %422, %v36_v6  }
  0x13   :  { %138 = vperm.xlu0 %421, %v42_v7  }
  0x14   :  { %423 = vset.pattern.permute.xlu1 %v455_v5 }
  0x15   :  { %133 = vperm.xlu1 %423, %v41_v8  }
  0x17   :  { %163 = vperm.xlu0 %421, %v49_v9  }
  0x19   :  { %123 = vperm.xlu1 %423, %v39_v10  }
  0x1b   :  { %153 = vperm.xlu0 %421, %v47_v11  }
  0x1d   :  { %128 = vperm.xlu1 %423, %v40_v12  }
  0x1f   :  { %245 = vperm.xlu0 %421, %v55_v13  }
  0x21   :  { %168 = vperm.xlu1 %423, %v50_v14  }
  0x23   :  { %255 = vperm.xlu0 %421, %v57_v15  }
  0x25   :  { %158 = vperm.xlu1 %423, %v48_v16  }
  0x27   :  { %334 = vperm.xlu0 %421, %v59_v17  }
  0x29   :  { %250 = vperm.xlu1 %423, %v56_v18  }
  0x2b   :  { %344 = vperm.xlu0 %421, %v61_v19  }
  0x2d   :  { %260 = vperm.xlu1 %423, %v58_v20  }
  0x2f   :  { %367 = vperm.xlu0 %421, %v63_v21  }
  0x31   :  { %339 = vperm.xlu1 %423, %v60_v23  }
  0x35   :  { %349 = vperm.xlu1 %423, %v62_v24  }
  0x7d   :  { %v103_v26 = vpop.permute.xlu1 %102  ;;  %v95_v27 = vpop.permute.xlu0 %94 }
  0x7e   :  { %v115_v43 = vmul.f32 %v112_v37, %v103_v26  ;;  %v113_v51 = vmul.f32 %v112_v37, %v95_v27 }
  0x81   :  { %v107_v29 = vpop.permute.xlu1 %106 }
  0x82   :  { %v78_v30 = vpop.permute.xlu0 %77  ;;  %v116_v40 = vmul.f32 %v112_v37, %v107_v29 }
  0x83   :  { %v91_v41 = vmul.f32 %v88_v36, %v78_v30 }
  0x85   :  { %v119_v47 = vadd.f32 %v115_v43, %v91_v41 }
  0x86   :  { %v73_v34 = vpop.permute.xlu1 %72  ;;  %v83_v35 = vpop.permute.xlu0 %82 }
  0x87   :  { %v92_v38 = vmul.f32 %v88_v36, %v83_v35  ;;  %v90_v55 = vmul.f32 %v88_v36, %v73_v34 }
  0x89   :  { %v120_v44 = vadd.f32 %v116_v40, %v92_v38 }
  0x8a   :  { %v68_v39 = vpop.permute.xlu0 %67 }
  0x8b   :  { %v99_v42 = vpop.permute.xlu1 %98  ;;  %v89_v48 = vmul.f32 %v88_v36, %v68_v39 }
  0x8c   :  { %v114_v52 = vmul.f32 %v112_v37, %v99_v42 }
  0x8d   :  { %v117_v54 = vadd.f32 %v113_v51, %v89_v48 }
  0x8e   :  { %v139_v45 = vpop.permute.xlu0 %138  ;;  %v118_v57 = vadd.f32 %v114_v52, %v90_v55 }
  0x8f   :  { %v144_v46 = vadd.f32 %v139_v45, %v120_v44 }
  0x90   :  { %v134_v49 = vpop.permute.xlu1 %133 }
  0x91   :  { %v143_v50 = vadd.f32 %v134_v49, %v119_v47  ;;  %428 = vtanh.f32 %v144_v46 }
  0x92   :  { %v164_v4 = vpop.permute.xlu0 %163 }
  0x93   :  { %430 = vtanh.f32 %v143_v50 }
  0x94   :  { %v124_v53 = vpop.permute.xlu1 %123 }
  0x95   :  { %v141_v56 = vadd.f32 %v124_v53, %v117_v54 }
  0x96   :  { %v154_v9 = vpop.permute.xlu0 %153 }
  0x97   :  { %432 = vtanh.f32 %v141_v56 }
  0x98   :  { %v129_v58 = vpop.permute.xlu1 %128 }
  0x99   :  { %v142_v59 = vadd.f32 %v129_v58, %v118_v57 }
  0x9a   :  { %v246_v23 = vpop.permute.xlu0 %245 }
  0x9b   :  { %434 = vtanh.f32 %v142_v59 }
  0x9c   :  { %v169_v5 = vpop.permute.xlu1 %168 }
  0x9e   :  { %v429_v60 = vpop.eup %428  ;;  %v256_v27 = vpop.permute.xlu0 %255 }
  0xa0   :  { %v431_v61 = vpop.eup %430  ;;  %v159_v13 = vpop.permute.xlu1 %158 }
  0xa1   :  { %v150_v62 = vpack.c.bf16 %v429_v60, %v431_v61 }
  0xa2   :  { %v335_v37 = vpop.permute.xlu0 %334 }
  0xa3   :  { %400 = vmatprep.subr.bf16.mxu0 %v150_v62 }
  0xa4   :  { %401 = vmatpush3.bf16.msra.mxu0 %v150_v62  ;;  %v433_v63 = vpop.eup %432  ;;  %v251_v24 = vpop.permute.xlu1 %250 }
  0xa6   :  { %v345_v45 = vpop.permute.xlu0 %344 }
  0xa8   :  { %v435_v0 = vpop.eup %434  ;;  %v261_v33 = vpop.permute.xlu1 %260 }
  0xa9   :  { %v149_v1 = vpack.c.bf16 %v435_v0, %v433_v63 }
  0xaa   :  { %v368_v56 = vpop.permute.xlu0 %367 }
  0xab   :  { %402 = vmatprep.subr.bf16.mxu0 %v149_v1  ;;  %v373_v58 = vrot.slane %v368_v56, %v87_v31 }
  0xac   :  { %403 = vmatpush3.bf16.msra.mxu0 %v149_v1  ;;  %v340_v39 = vpop.permute.xlu1 %339 }
  0xaf   :  { %405 = vmatmul.mubr.msk.bf16.vlgmr.msra.gmra.mxu0 %vm181_vm0, %v425_v2 }
  0xb0   :  { %v350_v48 = vpop.permute.xlu1 %349 }
 0x16f   :  { %v406_v6 = vpop.f32.mrf.mxu0 }
 0x170   :  { %v231_v7 = vadd.f32 %v406_v6, %v164_v4 }
 0x171   :  { %v222_v8 = vpop.f32.mrf.mxu0 }
 0x172   :  { %v223_v10 = vadd.f32 %v222_v8, %v154_v9  ;;  %436 = vtanh.f32 %v231_v7 }
 0x173   :  { %v407_v11 = vpop.f32.mrf.mxu0 }
 0x174   :  { %v234_v12 = vadd.f32 %v407_v11, %v169_v5 }
 0x175   :  { %v225_v14 = vpop.f32.mrf.mxu0 }
 0x176   :  { %438 = vtanh.f32 %v234_v12  ;;  %v226_v15 = vadd.f32 %v225_v14, %v159_v13 }
 0x177   :  { %440 = vtanh.f32 %v223_v10 }
 0x178   :  { %442 = vtanh.f32 %v226_v15 }
 0x17f   :  { %v437_v16 = vpop.eup %436 }
 0x183   :  { %v439_v17 = vpop.eup %438 }
 0x184   :  { %v441_v18 = vpop.eup %440  ;;  %v242_v19 = vpack.c.bf16 %v439_v17, %v437_v16 }
 0x185   :  { %v443_v20 = vpop.eup %442 }
 0x186   :  { %408 = vmatprep.subr.bf16.mxu1 %v242_v19  ;;  %v241_v21 = vpack.c.bf16 %v443_v20, %v441_v18 }
 0x187   :  { %409 = vmatpush3.bf16.msra.mxu1 %v242_v19 }
 0x188   :  { %410 = vmatprep.subr.bf16.mxu1 %v241_v21 }
 0x18b   :  { %411 = vmatpush3.bf16.msra.mxu1 %v241_v21 }
 0x18e   :  { %413 = vmatmul.mubr.msk.bf16.vlgmr.msra.gmra.mxu1 %vm181_vm0, %v427_v22 }
 0x24e   :  { %v414_v25 = vpop.f32.mrf.mxu1 }
 0x24f   :  { %v322_v30 = vadd.f32 %v414_v25, %v256_v27 }
 0x250   :  { %v313_v26 = vpop.f32.mrf.mxu1 }
 0x251   :  { %v314_v29 = vadd.f32 %v313_v26, %v246_v23 }
 0x252   :  { %v415_v32 = vpop.f32.mrf.mxu1 }
 0x253   :  { %444 = vtanh.f32 %v314_v29  ;;  %v325_v35 = vadd.f32 %v415_v32, %v261_v33 }
 0x254   :  { %v316_v34 = vpop.f32.mrf.mxu1  ;;  %446 = vtanh.f32 %v322_v30 }
 0x255   :  { %v317_v36 = vadd.f32 %v316_v34, %v251_v24 }
 0x257   :  { %448 = vtanh.f32 %v317_v36 }
 0x258   :  { %450 = vtanh.f32 %v325_v35 }
 0x260   :  { %v445_v38 = vpop.eup %444 }
 0x261   :  { %v447_v40 = vpop.eup %446  ;;  %v352_v42 = vmul.f32 %v445_v38, %v335_v37 }
 0x262   :  { %v354_v46 = vmul.f32 %v447_v40, %v345_v45 }
 0x264   :  { %v449_v41 = vpop.eup %448 }
 0x265   :  { %v353_v43 = vmul.f32 %v449_v41, %v340_v39  ;;  %v451_v44 = vpop.eup %450 }
 0x266   :  { %v355_v49 = vmul.f32 %v451_v44, %v350_v48 }
 0x267   :  { %v356_v47 = vadd.f32 %v353_v43, %v352_v42 }
 0x269   :  { %v357_v50 = vadd.f32 %v356_v47, %v354_v46 }
 0x26b   :  { %v358_v51 = vadd.f32 %v357_v50, %v355_v49 }
 0x26d   :  { %v359_v52 = vrot.slane %v358_v51, 4 }
 0x26f   :  { %v360_v53 = vadd.f32 %v359_v52, %v358_v51 }
 0x271   :  { %v361_v54 = vrot.slane %v360_v53, 2 }
 0x273   :  { %v362_v55 = vadd.f32 %v361_v54, %v360_v53 }
 0x275   :  { %v363_v57 = vrot.slane %v362_v55, 1 }
 0x277   :  { %v364_v59 = vadd.f32 %v363_v57, %v362_v55 }
 0x279   :  { %v374_v60 = vadd.f32 %v373_v58, %v364_v59 }
 0x27b   :  { %v375_v61 = vmul.f32 0.5, %v374_v60 }
 0x27d   :  { %452 = vtanh.f32 %v375_v61 }
 0x28a   :  { %v453_v62 = vpop.eup %452 }
 0x28b   :  { %v377_v63 = vmul.f32 0.5, %v453_v62 }
 0x28d   :  { %v378_v0 = vadd.f32 0.5, %v377_v63 }
 0x28f   :  { %379 = vst [vmem:[%s608_s9] sm:$0x1] %v378_v0 }

</bundles_post_ra>
